<compile_context>
chip_gen: v7x
topology: tpu7x:2x2x1
jax: 0.10.0
libtpu: 0.0.40
codegen_flags: <defaults>
</compile_context>

<pallas_src>
import jax
import jax.numpy as jnp
from jax.experimental import pallas as pl
from jax.experimental.pallas import tpu as pltpu


def _attn_general_kernel(hidden_ref, enc_ref, w_ref, b_ref, out_ref):
    """hidden_ref: (TB, H); enc_ref: (L, TB, H); w_ref: (H, H); b_ref: (1, H);
    out_ref: (TB, L)."""
    hidden = hidden_ref[...]
    enc = enc_ref[...]
    w = w_ref[...]
    bias = b_ref[...]

    # q[b, h] = sum_k hidden[b, k] * W[k, h]  -- single small MXU matmul, f32 accumulate.
    q = jnp.dot(hidden, w, preferred_element_type=jnp.float32)            # (TB, H) f32

    # hb[b] = hidden[b] . bias  (constant over l; kept for exact parity with torch).
    hb = jnp.sum(hidden.astype(jnp.float32) * bias.astype(jnp.float32),
                 axis=-1, keepdims=True)                                   # (TB, 1) f32

    # energies[b, l] = sum_h q[b, h] * enc[l, b, h] + hb[b].
    # H <= 128 here, so the contraction over the lane (minor) dim is a VPU multiply +
    # XLU lane-reduce, followed by a tiny (L, TB) -> (TB, L) transpose (XLU).
    prod = enc.astype(jnp.float32) * q[None, :, :]                         # (L, TB, H) f32
    energies = jnp.sum(prod, axis=-1).T + hb                               # (TB, L)   f32

    # Numerically stable softmax over L, all in f32 (VPU/EUP); the divide is replaced by
    # the EUP's approximate reciprocal (free bundle slot).
    m = jnp.max(energies, axis=-1, keepdims=True)
    p = jnp.exp(energies - m)
    s = jnp.sum(p, axis=-1, keepdims=True)
    out_ref[...] = p * pl.reciprocal(s, approx=True)                       # (TB, L)
    # NOTE: the store is fully lane-dense whenever L is a multiple of 128; for other L we
    # accept one masked tail store per batch tile (output is H x smaller than the enc
    # stream, so this is negligible) rather than pad/concat inside the kernel.


def _pick_batch_tile(B, L, H, itemsize):
    """Batch tile size: aim for ~4 MiB encoder tiles; keep the sublane dim a multiple of
    8 (or the full batch) so blocks double-buffer comfortably even in v7x's 64 MiB VMEM."""
    if B <= 8 or B % 8 != 0:
        return B
    tb = ((4 << 20) // max(L * H * itemsize, 1)) // 8 * 8
    tb = max(8, min(tb, B))
    while B % tb:
        tb -= 8
    return tb


def attn_general_forward(hidden, encoder_outputs, w, bias):
    """hidden: (1, B, H); encoder_outputs: (L, B, H); w: (H, H) nn.Linear weight; bias: (H,).
    Returns softmax attention weights of shape (B, 1, L), matching the torch module."""
    L, B, H = encoder_outputs.shape
    hidden2 = hidden.reshape(B, H)      # squeeze leading 1; no dtype cast in the wrapper
    bias2 = bias.reshape(1, H)

    tb = _pick_batch_tile(B, L, H, encoder_outputs.dtype.itemsize)

    out = pl.pallas_call(
        _attn_general_kernel,
        out_shape=jax.ShapeDtypeStruct((B, L), jnp.float32),
        grid=(B // tb,),
        in_specs=[
            pl.BlockSpec((tb, H), lambda i: (i, 0)),        # hidden (batch-tiled)
            pl.BlockSpec((L, tb, H), lambda i: (0, i, 0)),  # encoder_outputs, native layout
            pl.BlockSpec((H, H), lambda i: (0, 0)),         # W (replicated across tiles)
            pl.BlockSpec((1, H), lambda i: (0, 0)),         # bias (replicated)
        ],
        out_specs=pl.BlockSpec((tb, L), lambda i: (i, 0)),
        compiler_params=pltpu.CompilerParams(
            # Batch tiles are independent -> shard grid steps across v7x's 2 TensorCores.
            # (On v5e, deeper buffering via pipeline_mode=pl.Buffered(3) on the enc spec
            # is the knob to hide HBM latency; default depth 2 is used here.)
            dimension_semantics=("parallel",),
        ),
    )(hidden2, encoder_outputs, w, bias2)

    return out[:, None, :]              # unsqueeze(1) -> (B, 1, L)


def _reference(hidden, encoder_outputs, w, bias):
    # Pure-JAX reference of the torch double loop (original, non-restructured formulation).
    hp = jax.lax.Precision.HIGHEST
    transformed = jnp.einsum("lbh,kh->lbk", encoder_outputs, w, precision=hp) + bias
    energies = jnp.einsum("bh,lbh->bl", hidden[0], transformed, precision=hp)   # (B, L)
    return jax.nn.softmax(energies, axis=1)[:, None, :]                         # (B, 1, L)


if __name__ == "__main__":
    B, L, H = 2, 8, 32

    key = jax.random.PRNGKey(0)
    k_h, k_e, k_w, k_b = jax.random.split(key, 4)

    # Snap the matmul operands (hidden, W) to bf16-representable values so the check is
    # insensitive to how many MXU passes the in-kernel f32 matmul uses.
    hidden = jax.random.normal(k_h, (1, B, H), dtype=jnp.float32)
    hidden = hidden.astype(jnp.bfloat16).astype(jnp.float32)
    encoder_outputs = jax.random.normal(k_e, (L, B, H), dtype=jnp.float32)

    # deterministic nn.Linear(H, H) init: U(-1/sqrt(H), 1/sqrt(H))
    bound = 1.0 / (H ** 0.5)
    w = jax.random.uniform(k_w, (H, H), minval=-bound, maxval=bound, dtype=jnp.float32)
    w = w.astype(jnp.bfloat16).astype(jnp.float32)
    bias = jax.random.uniform(k_b, (H,), minval=-bound, maxval=bound, dtype=jnp.float32)

    out = attn_general_forward(hidden, encoder_outputs, w, bias)
    out = jax.block_until_ready(out)
    ref = _reference(hidden, encoder_outputs, w, bias)

    assert out.shape == (B, 1, L)
    # The kernel normalizes with the EUP's *approximate* reciprocal (a row-uniform scale),
    # so: loose direct comparison, plus a tight comparison after exact row renormalization
    # (which cancels that uniform factor and validates energies / exp / layout).
    assert jnp.allclose(out, ref, atol=1e-2, rtol=1e-2), float(jnp.max(jnp.abs(out - ref)))
    out_renorm = out / jnp.sum(out, axis=-1, keepdims=True)
    assert jnp.allclose(out_renorm, ref, atol=1e-4, rtol=1e-4), float(
        jnp.max(jnp.abs(out_renorm - ref)))
    # TODO(synk): 'dot' and 'concat' scoring variants not implemented; module uses 'general'.
    print("KERNEL_OK")
</pallas_src>

<mosaic_0001>
module attributes {stable_mosaic.version = 11 : i64} {
  func.func @_attn_general_kernel(%arg0: i32, %arg1: memref<2x32xf32, #tpu.memory_space<vmem>>, %arg2: memref<8x2x32xf32, #tpu.memory_space<vmem>>, %arg3: memref<32x32xf32, #tpu.memory_space<vmem>>, %arg4: memref<1x32xf32, #tpu.memory_space<vmem>>, %arg5: memref<2x8xf32, #tpu.memory_space<vmem>>) attributes {dimension_semantics = [#tpu.dimension_semantics<parallel>], iteration_bounds = array<i64: 1>, scalar_prefetch = 0 : i64, scratch_operands = 0 : i64, tpu.core_type = #tpu.core_type<tc>, window_params = [{transform_indices = @transform_0, window_bounds = array<i64: 2, 32>}, {transform_indices = @transform_1, window_bounds = array<i64: 8, 2, 32>}, {pipeline_mode = #tpu.pipeline_mode<synchronous>, transform_indices = @transform_2, window_bounds = array<i64: 32, 32>}, {pipeline_mode = #tpu.pipeline_mode<synchronous>, transform_indices = @transform_3, window_bounds = array<i64: 1, 32>}, {transform_indices = @transform_4, window_bounds = array<i64: 2, 8>}]} {
    %c0 = arith.constant 0 : index
    %c0_0 = arith.constant 0 : index
    %0 = vector.load %arg1[%c0, %c0_0] : memref<2x32xf32, #tpu.memory_space<vmem>>, vector<2x32xf32>
    %c0_1 = arith.constant 0 : index
    %c0_2 = arith.constant 0 : index
    %c0_3 = arith.constant 0 : index
    %1 = vector.load %arg2[%c0_1, %c0_2, %c0_3] : memref<8x2x32xf32, #tpu.memory_space<vmem>>, vector<8x2x32xf32>
    %c0_4 = arith.constant 0 : index
    %c0_5 = arith.constant 0 : index
    %2 = vector.load %arg3[%c0_4, %c0_5] : memref<32x32xf32, #tpu.memory_space<vmem>>, vector<32x32xf32>
    %c0_6 = arith.constant 0 : index
    %c0_7 = arith.constant 0 : index
    %3 = vector.load %arg4[%c0_6, %c0_7] : memref<1x32xf32, #tpu.memory_space<vmem>>, vector<1x32xf32>
    %cst = arith.constant dense<0.000000e+00> : vector<2x32xf32>
    %4 = tpu.matmul %0, %2, %cst {dimension_numbers = #tpu.dot_dimension_numbers<[1], [0], [0], [1], [0, 0, 1, 1], [], []>} : vector<2x32xf32>, vector<32x32xf32>, vector<2x32xf32> -> vector<2x32xf32>
    %5 = vector.broadcast %3 : vector<1x32xf32> to vector<2x32xf32>
    %6 = arith.mulf %0, %5 : vector<2x32xf32>
    %cst_8 = arith.constant dense<0.000000e+00> : vector<2xf32>
    %7 = vector.multi_reduction <add>, %6, %cst_8 [1] : vector<2x32xf32> to vector<2xf32>
    %8 = vector.shape_cast %7 : vector<2xf32> to vector<2x1xf32>
    %9 = vector.shape_cast %4 : vector<2x32xf32> to vector<1x2x32xf32>
    %10 = vector.broadcast %9 : vector<1x2x32xf32> to vector<8x2x32xf32>
    %11 = arith.mulf %1, %10 : vector<8x2x32xf32>
    %cst_9 = arith.constant dense<0.000000e+00> : vector<8x2xf32>
    %12 = vector.multi_reduction <add>, %11, %cst_9 [2] : vector<8x2x32xf32> to vector<8x2xf32>
    %13 = tpu.transpose %12, [1, 0] : vector<8x2xf32> -> vector<2x8xf32>
    %14 = vector.broadcast %8 : vector<2x1xf32> to vector<2x8xf32>
    %15 = arith.addf %13, %14 : vector<2x8xf32>
    %cst_10 = arith.constant dense<0xFF800000> : vector<2xf32>
    %16 = vector.multi_reduction <maximumf>, %15, %cst_10 [1] : vector<2x8xf32> to vector<2xf32>
    %17 = vector.shape_cast %16 : vector<2xf32> to vector<2x1xf32>
    %18 = vector.broadcast %17 : vector<2x1xf32> to vector<2x8xf32>
    %19 = arith.subf %15, %18 : vector<2x8xf32>
    %20 = math.exp %19 : vector<2x8xf32>
    %cst_11 = arith.constant dense<0.000000e+00> : vector<2xf32>
    %21 = vector.multi_reduction <add>, %20, %cst_11 [1] : vector<2x8xf32> to vector<2xf32>
    %22 = vector.shape_cast %21 : vector<2xf32> to vector<2x1xf32>
    %23 = tpu.reciprocal %22 {approx = true} : vector<2x1xf32> -> vector<2x1xf32>
    %24 = vector.broadcast %23 : vector<2x1xf32> to vector<2x8xf32>
    %25 = arith.mulf %20, %24 : vector<2x8xf32>
    %c0_12 = arith.constant 0 : index
    %c0_13 = arith.constant 0 : index
    %26 = vector.load %arg5[%c0_12, %c0_13] : memref<2x8xf32, #tpu.memory_space<vmem>>, vector<2x8xf32>
    tpu.vector_store %arg5[%c0_12, %c0_13], %25 {strides = array<i32>} : memref<2x8xf32, #tpu.memory_space<vmem>>, vector<2x8xf32>,
    return
  }
  func.func @transform_0(%arg0: i32) -> (i32, i32) {
    %c0_i32 = arith.constant 0 : i32
    %c0_i32_0 = arith.constant 0 : i32
    return %arg0, %c0_i32 : i32, i32
  }
  func.func @transform_1(%arg0: i32) -> (i32, i32, i32) {
    %c0_i32 = arith.constant 0 : i32
    %c0_i32_0 = arith.constant 0 : i32
    %c0_i32_1 = arith.constant 0 : i32
    return %c0_i32, %arg0, %c0_i32_0 : i32, i32, i32
  }
  func.func @transform_2(%arg0: i32) -> (i32, i32) {
    %c0_i32 = arith.constant 0 : i32
    %c0_i32_0 = arith.constant 0 : i32
    %c0_i32_1 = arith.constant 0 : i32
    return %c0_i32, %c0_i32_0 : i32, i32
  }
  func.func @transform_3(%arg0: i32) -> (i32, i32) {
    %c0_i32 = arith.constant 0 : i32
    %c0_i32_0 = arith.constant 0 : i32
    %c0_i32_1 = arith.constant 0 : i32
    return %c0_i32, %c0_i32_0 : i32, i32
  }
  func.func @transform_4(%arg0: i32) -> (i32, i32) {
    %c0_i32 = arith.constant 0 : i32
    %c0_i32_0 = arith.constant 0 : i32
    return %arg0, %c0_i32 : i32, i32
  }
}

</mosaic_0001>

<bundles_post_ra>
// kernel: tpu_custom_call.1
= control target key start
LH: loop header
LB: loop body
LE: loop exit
PB: predicated region body
PF: predicated region fallthrough
CT: control target
= control target key end

     0   :  { %9 = vsyncpa [#allocation3], 0  ;;  %s539_s0 = inlined_call_operand.hbm [shape: f32[2,32], index: 0, kind: input, shape index: {}]   ;;  %s540_s1 = inlined_call_operand.hbm [shape: f32[8,2,32], index: 1, kind: input, shape index: {}]   ;;  %s541_s2 = inlined_call_operand.hbm [shape: f32[32,32], index: 2, kind: input, shape index: {}]   ;;  %s542_s3 = inlined_call_operand.vmem [shape: f32[1,32], index: 3, kind: input, shape index: {}]   ;;  %s543_s4 = inlined_call_operand.hbm [shape: f32[2,8], index: 4, kind: output, shape index: {}]  }
   0x1   :  { %10 = vsyncpa [#allocation6], 0 }
   0x2   :  { %11 = vsyncpa [#allocation4], 0  ;;  %s440_s15 = smov [#allocation5]   ;;  %s346_s19 = scalar_lea.hbm %s540_s1, 256 }
   0x3   :  { %s27_s16 = sshll.u32 %s440_s15, 4  ;;  %p347_p0 = scmp.ne.s32.totalorder %s540_s1, %s346_s19  ;;  %s28_s16 = int_to_ptr.vmem [resolvable:$true] %s27_s16 }
   0x4   :  { %p350_p1 = scmp.lt.u32.totalorder %s346_s19, %s540_s1 }
   0x6   :  { %p352_p2 = pnand %p350_p1, %p347_p0 }
   0x8   :  { %355 = shalt.err (!%p352_p2)
}
   0x9   :  { %s356_s24 = scalar_lea.vmem %s28_s16, 256  ;;  %p361_p4 = scmp.lt.s32.totalorder %s28_s16, %s28_s16 }
   0xa   :  { %p357_p3 = scmp.ne.s32.totalorder %s28_s16, %s356_s24  ;;  %p362_p5 = scmp.lt.s32.totalorder %s356_s24, %s356_s24 }
   0xc   :  { %p363_p6 = por %p362_p5, %p361_p4 }
   0xe   :  { %p364_p7 = pnand %p363_p6, %p357_p3 }
  0x10   :  { %367 = shalt.err (!%p364_p7)
}
  0x11   :  { %s441_s25 = smov 32   ;;  %s442_s26 = smov 2  }
  0x12   :  { %33 = dma.hbm_to_vmem [thread:$0]  %s540_s1, 256, %s28_s16, [#allocation6], %s441_s25, %s441_s25, %s442_s26  }
  0x13   :  { %s443_s29 = smov [#allocation2]   ;;  %s444_s5 = smov [#allocation7]  }
  0x14   :  { %s18_s30 = sshll.u32 %s443_s29, 4  ;;  %s39_s6 = sshll.u32 %s444_s5, 4  ;;  %s19_s30 = int_to_ptr.vmem [resolvable:$true] %s18_s30  ;;  %s40_s6 = int_to_ptr.vmem [resolvable:$true] %s39_s6 }
  0x15   :  { %s368_s9 = scalar_lea.hbm %s539_s0, 32 }
  0x16   :  { %p369_p8 = scmp.ne.s32.totalorder %s539_s0, %s368_s9  ;;  %p372_p9 = scmp.lt.u32.totalorder %s368_s9, %s539_s0 }
  0x18   :  { %p374_p10 = pnand %p372_p9, %p369_p8 }
  0x1a   :  { %377 = shalt.err (!%p374_p10)
}
  0x1b   :  { %s378_s1 = scalar_lea.vmem %s19_s30, 32  ;;  %p383_p12 = scmp.lt.s32.totalorder %s19_s30, %s19_s30 }
  0x1c   :  { %p379_p11 = scmp.ne.s32.totalorder %s19_s30, %s378_s1  ;;  %p384_p13 = scmp.lt.s32.totalorder %s378_s1, %s378_s1 }
  0x1e   :  { %p385_p0 = por %p384_p13, %p383_p12 }
  0x20   :  { %p386_p1 = pnand %p385_p0, %p379_p11 }
  0x22   :  { %389 = shalt.err (!%p386_p1)
}
  0x23   :  { %21 = dma.hbm_to_vmem [thread:$0]  %s539_s0, 32, %s19_s30, [#allocation3]  }
  0x24   :  { %s390_s18 = scalar_lea.hbm %s541_s2, 512 }
  0x25   :  { %p391_p2 = scmp.ne.s32.totalorder %s541_s2, %s390_s18  ;;  %p394_p3 = scmp.lt.u32.totalorder %s390_s18, %s541_s2 }
  0x27   :  { %p396_p4 = pnand %p394_p3, %p391_p2 }
  0x29   :  { %399 = shalt.err (!%p396_p4)
}
  0x2a   :  { %s400_s23 = scalar_lea.vmem %s40_s6, 512  ;;  %p405_p6 = scmp.lt.s32.totalorder %s40_s6, %s40_s6 }
  0x2b   :  { %p401_p5 = scmp.ne.s32.totalorder %s40_s6, %s400_s23  ;;  %p406_p7 = scmp.lt.s32.totalorder %s400_s23, %s400_s23 }
  0x2d   :  { %p407_p8 = por %p406_p7, %p405_p6 }
  0x2f   :  { %p408_p9 = pnand %p407_p8, %p401_p5 }
  0x31   :  { %411 = shalt.err (!%p408_p9)
}
  0x32   :  { %s445_s0 = smov 128   ;;  %s446_s24 = smov 8  }
  0x33   :  { %45 = dma.hbm_to_vmem [thread:$0]  %s541_s2, 512, %s40_s6, [#allocation6], %s445_s0, %s445_s0, %s446_s24  }
  0x34   :  { %434 = dma.done.wait [#allocation3], 32  }
  0x35   :  { %435 = vsyncadd [#allocation3], 4294967264 }
  0x36   :  { %436 = dma.done.wait [#allocation6], 768  }
  0x37   :  { %437 = vsyncadd [#allocation6], 4294966528  ;;  %v447_v0 = vmov 0.0|0.0   ;;  %vm448_vm0 = vmmov 0   ;;  %v449_v1 = vmov 0.0   ;;  %v66_v2 = vld [vmem:[#allocation7] sm:$0xff]  ;;  %v196_v38 = vlaneseq }
  0x38   :  { %325 = vmatprep.subr.bf16.mxu0 %v447_v0  ;;  %322 = vmatprep.mubr.msk.f32.mxu0 %vm448_vm0, %v449_v1  ;;  %v67_v3 = vld [vmem:[#allocation7 + $0x8] sm:$0xff]  ;;  %v68_v4 = vld [vmem:[#allocation7 + $0x10] sm:$0xff]  ;;  %v69_v6 = vld [vmem:[#allocation7 + $0x18] sm:$0xff]  ;;  %vm71_vm1 = vcmask 261120   ;;  %vm152_vm2 = vcmask 254976   ;;  %vm230_vm3 = vcmask 1041409  }
  0x39   :  { %v326_v5 = vpack.c.bf16 %v67_v3, %v66_v2  ;;  %v329_v7 = vpack.c.bf16 %v69_v6, %v68_v4  ;;  %v57_v8 = vld [vmem:[#allocation2] sm:$0x3]  ;;  %v60_v9 = vld [vmem:[#allocation5 + $0x4] sm:$0x3]  ;;  %v58_v10 = vld [vmem:[#allocation5] sm:$0x3] }
  0x3a   :  { %v61_v12 = vld [vmem:[#allocation5 + $0x6] sm:$0x3]  ;;  %v59_v13 = vld [vmem:[#allocation5 + $0x2] sm:$0x3]  ;;  %v63_v21 = vld [vmem:[#allocation5 + $0xa] sm:$0x3] }
  0x3b   :  { %327 = vmatpush3.bf16.msra.mxu0 %v326_v5  ;;  %v62_v22 = vld [vmem:[#allocation5 + $0x8] sm:$0x3]  ;;  %v65_v27 = vld [vmem:[#allocation5 + $0xe] sm:$0x3]  ;;  %v64_v28 = vld [vmem:[#allocation5 + $0xc] sm:$0x3] }
  0x3c   :  { %328 = vmatprep.subr.bf16.mxu0 %v447_v0  ;;  %v308_v35 = vld [vmem:[%s542_s3] ss:$0 sm:$0xff]  ;;  %v197_v39 = vand.u32 127, %v196_v38  ;;  %v199_v40 = vshrl.u32 %v196_v38, 7  ;;  %vm232_vm4 = vcmask 1042434   ;;  %vm234_vm5 = vcmask 1043459  }
  0x3d   :  { %v151_v36 = vmul.f32 %v308_v35, %v57_v8  ;;  %vm236_vm6 = vcmask 1044484   ;;  %vm238_vm7 = vcmask 1045509   ;;  %vm240_vm8 = vcmask 1046534   ;;  %s450_s3 = smov [#allocation8]  }
  0x3e   :  { %v200_v43 = vsub.s32 %v197_v39, %v199_v40  ;;  %vm242_vm9 = vcmask 1047559   ;;  %vm278_vm10 = vcmask 58368   ;;  %s297_s28 = sshll.u32 %s450_s3, 4  ;;  %s298_s28 = int_to_ptr.vmem [resolvable:$true] %s297_s28 }
  0x3f   :  { %330 = vmatpush3.bf16.msra.mxu0 %v329_v7  ;;  %v153_v37 = vsel %vm152_vm2, %v151_v36, 0.0  ;;  %s412_s29 = scalar_lea.vmem %s298_s28, 32  ;;  %p417_p11 = scmp.lt.s32.totalorder %s298_s28, %s298_s28 }
  0x40   :  { %p413_p10 = scmp.ne.s32.totalorder %s298_s28, %s412_s29  ;;  %p418_p12 = scmp.lt.s32.totalorder %s412_s29, %s412_s29 }
  0x42   :  { %323 = vmatmul.mubr.msk.f32.vlgmr.msra.gmra.mrb[0].mxu0 %vm71_vm1, %v57_v8  ;;  %p419_p13 = por %p418_p12, %p417_p11 }
  0x44   :  { %p420_p0 = pnand %p419_p13, %p413_p10 }
 0x115   :  { %v141_v11 = vpop.f32.mrb[0].mxu0 }
 0x116   :  { %v324_v14 = vpop.f32.mrb[1].mxu0  ;;  %v158_v15 = vmul.f32 %v141_v11, %v60_v9  ;;  %v156_v16 = vmul.f32 %v141_v11, %v58_v10  ;;  %v159_v19 = vmul.f32 %v141_v11, %v61_v12  ;;  %v157_v20 = vmul.f32 %v141_v11, %v59_v13 }
 0x117   :  { %v161_v25 = vmul.f32 %v141_v11, %v63_v21  ;;  %v160_v26 = vmul.f32 %v141_v11, %v62_v22  ;;  %v163_v31 = vmul.f32 %v141_v11, %v65_v27  ;;  %v162_v32 = vmul.f32 %v141_v11, %v64_v28 }
 0x118   :  { %v170_v17 = vsel %vm152_vm2, %v158_v15, 0.0  ;;  %v164_v18 = vsel %vm152_vm2, %v156_v16, 0.0  ;;  %v173_v23 = vsel %vm152_vm2, %v159_v19, 0.0  ;;  %v167_v24 = vsel %vm152_vm2, %v157_v20, 0.0 }
 0x119   :  { %171 = vadd.xlane.f32.xlu1 %v170_v17  ;;  %165 = vadd.xlane.f32.xlu0 %v164_v18  ;;  %v179_v29 = vsel %vm152_vm2, %v161_v25, 0.0  ;;  %v176_v30 = vsel %vm152_vm2, %v160_v26, 0.0  ;;  %v185_v33 = vsel %vm152_vm2, %v163_v31, 0.0  ;;  %v182_v34 = vsel %vm152_vm2, %v162_v32, 0.0 }
 0x11d   :  { %174 = vadd.xlane.f32.xlu1 %v173_v23  ;;  %168 = vadd.xlane.f32.xlu0 %v167_v24 }
 0x121   :  { %180 = vadd.xlane.f32.xlu1 %v179_v29  ;;  %177 = vadd.xlane.f32.xlu0 %v176_v30 }
 0x125   :  { %186 = vadd.xlane.f32.xlu1 %v185_v33  ;;  %183 = vadd.xlane.f32.xlu0 %v182_v34 }
 0x129   :  { %154 = vadd.xlane.f32.xlu0 %v153_v37 }
 0x1a6   :  { %v172_v41 = vpop.xlane.xlu1 %171  ;;  %v166_v42 = vpop.xlane.xlu0 %165 }
 0x1a7   :  { %v201_v46 = vrot.slane %v166_v42, %v200_v43  ;;  %v209_v48 = vrot.slane %v172_v41, %v200_v43 }
 0x1aa   :  { %v175_v44 = vpop.xlane.xlu1 %174  ;;  %v169_v45 = vpop.xlane.xlu0 %168 }
 0x1ab   :  { %v205_v47 = vrot.slane %v169_v45, %v200_v43  ;;  %v213_v49 = vrot.slane %v175_v44, %v200_v43 }
 0x1ad   :  { %v231_v50 = vsel %vm230_vm3, %v205_v47, %v201_v46 }
 0x1ae   :  { %v233_v51 = vsel %vm232_vm4, %v209_v48, %v231_v50  ;;  %v181_v52 = vpop.xlane.xlu1 %180  ;;  %v178_v53 = vpop.xlane.xlu0 %177 }
 0x1af   :  { %v235_v54 = vsel %vm234_vm5, %v213_v49, %v233_v51  ;;  %v217_v55 = vrot.slane %v178_v53, %v200_v43  ;;  %v221_v56 = vrot.slane %v181_v52, %v200_v43 }
 0x1b1   :  { %v237_v57 = vsel %vm236_vm6, %v217_v55, %v235_v54 }
 0x1b2   :  { %v187_v58 = vpop.xlane.xlu1 %186  ;;  %v184_v59 = vpop.xlane.xlu0 %183  ;;  %v239_v62 = vsel %vm238_vm7, %v221_v56, %v237_v57 }
 0x1b3   :  { %v229_v60 = vrot.slane %v187_v58, %v200_v43  ;;  %v225_v61 = vrot.slane %v184_v59, %v200_v43 }
 0x1b5   :  { %v241_v63 = vsel %vm240_vm8, %v225_v61, %v239_v62 }
 0x1b6   :  { %v243_v0 = vsel %vm242_vm9, %v229_v60, %v241_v63  ;;  %v155_v1 = vpop.xlane.xlu0 %154 }
 0x1b7   :  { %245 = vxpose.xlu1.b32.start.end [1/1] (short) (narrow) %v243_v0, 8 }
 0x237   :  { %v261_v2 = vpop.trf.xlu1 }
 0x238   :  { %v277_v3 = vadd.f32 %v261_v2, %v155_v1 }
 0x23a   :  { %v279_v4 = vsel %vm278_vm10, %v277_v3, -inf }
 0x23b   :  { %280 = vmax.xlane.f32.xlu0 %v279_v4 }
 0x2c8   :  { %v281_v5 = vpop.xlane.xlu0 %280 }
 0x2c9   :  { %v282_v6 = vsub.f32 %v277_v3, %v281_v5 }
 0x2cb   :  { %v283_v7 = vmul.f32 1.442695, %v282_v6 }
 0x2cd   :  { %342 = vpow2.f32 %v283_v7 }
 0x2d7   :  { %v343_v8 = vpop.eup %342 }
 0x2d8   :  { %v285_v9 = vsel %vm278_vm10, %v343_v8, 0.0 }
 0x2d9   :  { %286 = vadd.xlane.f32.xlu0 %v285_v9 }
 0x366   :  { %v287_v10 = vpop.xlane.xlu0 %286 }
 0x367   :  { %344 = vrcp.f32 %v287_v10 }
 0x371   :  { %v345_v11 = vpop.eup %344 }
 0x372   :  { %v289_v12 = vmul.f32 %v345_v11, %v343_v8 }
 0x374   :  { %290 = vst.msk [vmem:[#allocation8] sm:$0x3] %vm278_vm10, %v289_v12 }
 0x375   :  { %423 = shalt.err (!%p420_p0)
}
 0x376   :  { %s424_s6 = scalar_lea.hbm %s543_s4, 32 }
 0x377   :  { %p425_p1 = scmp.ne.s32.totalorder %s543_s4, %s424_s6  ;;  %p428_p2 = scmp.lt.u32.totalorder %s424_s6, %s543_s4 }
 0x379   :  { %p430_p3 = pnand %p428_p2, %p425_p1 }
 0x37b   :  { %433 = shalt.err (!%p430_p3)
}
 0x37c   :  { %300 = dma.vmem_to_hbm [thread:$0]  %s298_s28, 32, %s543_s4, [#allocation4]  }
 0x37d   :  { %438 = dma.done.wait [#allocation4], 32  }
 0x37e   :  { %439 = vsyncadd [#allocation4], 4294967264 }
 0x37f   :  { %304 = vsyncpa [#allocation3], 1 }
 0x380   :  { %305 = vsyncpa [#allocation6], 1 }
 0x381   :  { %306 = vsyncpa [#allocation4], 1 }

</bundles_post_ra>
